<compile_context>
chip_gen: v6e
topology: v6e:2x2x1
jax: 0.10.0
libtpu: 0.0.40
codegen_flags: <defaults>
</compile_context>

<pallas_src>
import jax
import jax.numpy as jnp
from jax.experimental import pallas as pl
from jax.experimental.pallas import tpu as pltpu


def _round_up(x, m):
    return ((x + m - 1) // m) * m


def _compat_kernel(x1_ref, w1t_ref, wp_ref, o_ref):
    # h = tanh(x1 @ W1^T)                       (TM, d_in)   MXU + EUP
    h = jnp.tanh(
        jnp.dot(x1_ref[...], w1t_ref[...], preferred_element_type=jnp.float32)
    )
    # out = h @ (W2^T @ x2^T)   (pre-folded)    (TM, C)      MXU
    o_ref[...] = jnp.dot(
        h, wp_ref[...], preferred_element_type=jnp.float32
    ).astype(o_ref.dtype)


def compatibility_forward(x1, x2, w1, w2, *, tm=4096, use_bf16_inputs=False):
    """x1: (N, S, d_in), x2: (C, d_out), w1: fc1.weight (d_in, d_in),
    w2: fc2.weight (d_out, d_in).  Returns tanh(x1 @ w1.T) @ w2.T @ x2.T."""
    N, S, d_in = x1.shape
    C, d_out = x2.shape
    M = N * S
    out_dtype = x1.dtype

    # ---- wrapper-side pre-folding: W2^T @ x2^T -> (d_in, C) ----------------
    w1t = w1.T                                   # (d_in, d_in)
    wp = jnp.dot(w2.T, x2.T)                     # (d_in, C)

    # Flatten the sample/segment axes (free reshape, contiguous).
    x1_flat = x1.reshape(M, d_in)

    if use_bf16_inputs:
        # Optional bandwidth lever for v6e/v7x; accumulation stays f32.
        x1_flat = x1_flat.astype(jnp.bfloat16)
        w1t = w1t.astype(jnp.bfloat16)
        wp = wp.astype(jnp.bfloat16)

    # ---- tile the M = N*S axis ---------------------------------------------
    # Large tiles amortize per-grid-step overhead; keep TM a multiple of 8.
    TM = min(tm, _round_up(M, 8))
    # Ensure >= 2 grid programs when M allows it so ("parallel",) actually
    # shards across both TensorCores on v7x (harmless on v5e/v6e).
    if pl.cdiv(M, TM) < 2 and M > 8:
        TM = max(8, _round_up(pl.cdiv(M, 2), 8))
    grid = (pl.cdiv(M, TM),)                     # ragged last tile handled by Pallas

    out = pl.pallas_call(
        _compat_kernel,
        out_shape=jax.ShapeDtypeStruct((M, C), out_dtype),
        grid=grid,
        in_specs=[
            # x1 tiles stream through; weights stay VMEM-resident.
            pl.BlockSpec((TM, d_in), lambda i: (i, 0)),
            pl.BlockSpec((d_in, d_in), lambda i: (0, 0)),
            pl.BlockSpec((d_in, C), lambda i: (0, 0)),
        ],
        # Unpadded (TM, C) output block: last dim equals the full array dim,
        # so the block is legal and the HBM write stays contiguous.
        out_specs=pl.BlockSpec((TM, C), lambda i: (i, 0)),
        compiler_params=pltpu.CompilerParams(
            dimension_semantics=("parallel",),
        ),
    )(x1_flat, w1t, wp)

    return out.reshape(N, S, C)


def xavier_normal(key, shape, gain=0.1):
    # nn.Linear weight shape is (out_features, in_features)
    fan_out, fan_in = shape
    std = gain * jnp.sqrt(2.0 / (fan_in + fan_out))
    return std * jax.random.normal(key, shape, dtype=jnp.float32)


if __name__ == "__main__":
    # Small shapes consistent with the module
    num_samples, num_segments = 2, 8
    d_in, d_out, num_classes = 32, 32, 10

    key = jax.random.PRNGKey(0)
    k_x1, k_x2, k_w1, k_w2 = jax.random.split(key, 4)

    x1 = jax.random.normal(k_x1, (num_samples, num_segments, d_in), dtype=jnp.float32)
    x2 = jax.random.normal(k_x2, (num_classes, d_out), dtype=jnp.float32)

    # Deterministic parameter init mirroring init_layer (xavier_normal_, gain=0.1)
    w1 = xavier_normal(k_w1, (d_in, d_in))    # fc1.weight: (hidden, d_in)
    w2 = xavier_normal(k_w2, (d_out, d_in))   # fc2.weight: (d_out, hidden)

    out = compatibility_forward(x1, x2, w1, w2)
    out = jax.block_until_ready(out)

    # Pure-JAX reference check (original 3-dot association)
    ref = jnp.tanh(x1 @ w1.T) @ w2.T @ x2.T
    assert out.shape == (num_samples, num_segments, num_classes)
    assert jnp.allclose(out, ref, atol=1e-5, rtol=1e-4)

    print("KERNEL_OK")
</pallas_src>

<mosaic_0001>
module attributes {stable_mosaic.version = 11 : i64} {
  func.func @_compat_kernel(%arg0: i32, %arg1: memref<8x32xf32, #tpu.memory_space<vmem>>, %arg2: memref<32x32xf32, #tpu.memory_space<vmem>>, %arg3: memref<32x10xf32, #tpu.memory_space<vmem>>, %arg4: memref<8x10xf32, #tpu.memory_space<vmem>>) attributes {dimension_semantics = [#tpu.dimension_semantics<parallel>], iteration_bounds = array<i64: 2>, scalar_prefetch = 0 : i64, scratch_operands = 0 : i64, tpu.core_type = #tpu.core_type<tc>, window_params = [{transform_indices = @transform_0, window_bounds = array<i64: 8, 32>}, {pipeline_mode = #tpu.pipeline_mode<synchronous>, transform_indices = @transform_1, window_bounds = array<i64: 32, 32>}, {pipeline_mode = #tpu.pipeline_mode<synchronous>, transform_indices = @transform_2, window_bounds = array<i64: 32, 10>}, {transform_indices = @transform_3, window_bounds = array<i64: 8, 10>}]} {
    %c0 = arith.constant 0 : index
    %c0_0 = arith.constant 0 : index
    %0 = vector.load %arg1[%c0, %c0_0] : memref<8x32xf32, #tpu.memory_space<vmem>>, vector<8x32xf32>
    %c0_1 = arith.constant 0 : index
    %c0_2 = arith.constant 0 : index
    %1 = vector.load %arg2[%c0_1, %c0_2] : memref<32x32xf32, #tpu.memory_space<vmem>>, vector<32x32xf32>
    %cst = arith.constant dense<0.000000e+00> : vector<8x32xf32>
    %2 = tpu.matmul %0, %1, %cst {dimension_numbers = #tpu.dot_dimension_numbers<[1], [0], [0], [1], [0, 0, 1, 1], [], []>} : vector<8x32xf32>, vector<32x32xf32>, vector<8x32xf32> -> vector<8x32xf32>
    %3 = math.tanh %2 : vector<8x32xf32>
    %c0_3 = arith.constant 0 : index
    %c0_4 = arith.constant 0 : index
    %4 = vector.load %arg3[%c0_3, %c0_4] : memref<32x10xf32, #tpu.memory_space<vmem>>, vector<32x10xf32>
    %cst_5 = arith.constant dense<0.000000e+00> : vector<8x10xf32>
    %5 = tpu.matmul %3, %4, %cst_5 {dimension_numbers = #tpu.dot_dimension_numbers<[1], [0], [0], [1], [0, 0, 1, 1], [], []>} : vector<8x32xf32>, vector<32x10xf32>, vector<8x10xf32> -> vector<8x10xf32>
    %c0_6 = arith.constant 0 : index
    %c0_7 = arith.constant 0 : index
    %6 = vector.load %arg4[%c0_6, %c0_7] : memref<8x10xf32, #tpu.memory_space<vmem>>, vector<8x10xf32>
    tpu.vector_store %arg4[%c0_6, %c0_7], %5 {strides = array<i32>} : memref<8x10xf32, #tpu.memory_space<vmem>>, vector<8x10xf32>,
    return
  }
  func.func @transform_0(%arg0: i32) -> (i32, i32) {
    %c0_i32 = arith.constant 0 : i32
    %c0_i32_0 = arith.constant 0 : i32
    return %arg0, %c0_i32 : i32, i32
  }
  func.func @transform_1(%arg0: i32) -> (i32, i32) {
    %c0_i32 = arith.constant 0 : i32
    %c0_i32_0 = arith.constant 0 : i32
    %c0_i32_1 = arith.constant 0 : i32
    return %c0_i32, %c0_i32_0 : i32, i32
  }
  func.func @transform_2(%arg0: i32) -> (i32, i32) {
    %c0_i32 = arith.constant 0 : i32
    %c0_i32_0 = arith.constant 0 : i32
    %c0_i32_1 = arith.constant 0 : i32
    return %c0_i32, %c0_i32_0 : i32, i32
  }
  func.func @transform_3(%arg0: i32) -> (i32, i32) {
    %c0_i32 = arith.constant 0 : i32
    %c0_i32_0 = arith.constant 0 : i32
    return %arg0, %c0_i32 : i32, i32
  }
}

</mosaic_0001>

<bundles_post_ra>
// kernel: tpu_custom_call.1
= control target key start
LH: loop header
LB: loop body
LE: loop exit
PB: predicated region body
PF: predicated region fallthrough
CT: control target
= control target key end

     0   :  { %8 = vsyncpa [#allocation3], 0  ;;  %s695_s0 = inlined_call_operand.vmem [shape: f32[16,32], index: 0, kind: input, shape index: {}]   ;;  %s696_s1 = inlined_call_operand.vmem [shape: f32[32,32], index: 1, kind: input, shape index: {}]   ;;  %s697_s2 = inlined_call_operand.vmem [shape: f32[32,10], index: 2, kind: input, shape index: {}]   ;;  %s698_s3 = inlined_call_operand.hbm [shape: f32[16,10], index: 3, kind: output, shape index: {}]  }
   0x1   :  { %10 = vsyncpa [#allocation3 + $0x1], 0  ;;  %s570_s12 = smov 0   ;;  %s572_s13 = smov 0  }
   0x2   :  { %s574_s14 = smov 0   ;;  %s576_s15 = smov 0  }
   0x3 LB: > { %s591_s16 = sadd.s32 4294967295, %s545_s15   ;;  %s398_s17 = sadd.s32 4294967294, %s545_s15   ;;  %s545_s15 = sphi %s576_s15, %s704_s15   ;;  %s541_s14 = sphi %s574_s14, %s703_s14   ;;  %s537_s13 = sphi %s572_s13, %s702_s13   ;;  %s533_s12 = sphi %s570_s12, %s701_s12  }
   0x4   : > { %s595_s18 = sadd.s32 1, %s545_s15   ;;  %s91_s19 = sadd.s32 1, %s541_s14 }
   0x5   : > { %s88_s20 = ssub.s32 %s545_s15, %s595_s18  ;;  %p101_p0 = scmp.ne.s32.totalorder %s541_s14, %s537_s13 }
   0x6   : > { %p89_p1 = scmp.eq.s32.totalorder %s88_s20, 0  ;;  %p102_p2 = scmp.eq.s32.totalorder %s591_s16, 1 }
   0x7   : > { %p107_p3 = scmp.ne.s32.totalorder %s537_s13, %s533_s12  ;;  %p108_p4 = scmp.eq.s32.totalorder %s398_s17, 1 }
   0x8   : > { %s606_s21 = scalar_select %p89_p1, %s541_s14, %s91_s19  }
   0x9   : > { %p608_p5 = por %p102_p2, %p101_p0  ;;  %p612_p6 = por %p108_p4, %p107_p3 }
   0xa   : > { %p401_p7 = scmp.ge.s32.totalorder %s545_s15, 1  ;;  %p139_p8 = scmp.lt.s32.totalorder %s545_s15, 3 }
   0xc   : > { %p140_p9 = pnand %p401_p7, %p139_p8 }
   0xd   : > { %p162_p10 = scmp.lt.s32.totalorder (!%p140_p9), %s591_s16, 1  ;;  %s159_s27 = sand.u32 (!%p140_p9), 1, %s537_s13  }
   0xe   : > { %143 = sbr.rel (%p140_p9) target bundleno = 442 (0x1ba), region = 32  ;;  %s407_s29 = sshll.u32 (!%p140_p9), %s591_s16, 7 }
   0xf   : > { %s654_s7 = scalar_lea.hbm (!%p140_p9), %s698_s3, %s407_s29  ;;  %s326_s8 = scalar_lea.sflag (!%p140_p9), [#allocation3], %s159_s27 }
  0x13   : > { %v170_v0 = vld [vmem:[%s696_s1 + $0x18] sm:$0xff]  ;;  %v547_v1 = vmov 0.0   ;;  %v169_v2 = vld [vmem:[%s696_s1 + $0x10] sm:$0xff]  ;;  %vm548_vm0 = vmmov 0   ;;  %s163_s28 = scalar_select %p162_p10, %s591_s16, 1  ;;  %v168_v3 = vld [vmem:[%s696_s1 + $0x8] sm:$0xff] }
  0x14   : > { %420 = vmatprep.subr.mxu0 %v547_v1  ;;  %428 = vmatprep.mubr.msk.f32.mxu0 %vm548_vm0, %v547_v1  ;;  %v167_v4 = vld [vmem:[%s696_s1] sm:$0xff]  ;;  %vm171_vm1 = vcmask 261120   ;;  %v249_v6 = vld [vmem:[%s697_s2 + $0x18] sm:$0xff]  ;;  %v248_v7 = vld [vmem:[%s697_s2 + $0x10] sm:$0xff]  ;;  %vm323_vm2 = vcmask 80896   ;;  %s549_s16 = smov [#allocation2]  }
  0x15   : > { %421 = vmatpush3.msra.mxu0 %v170_v0  ;;  %431 = vmatprep.subr.mxu1 %v547_v1  ;;  %s403_s4 = sshll.u32 %s163_s28, 3  ;;  %v247_v8 = vld [vmem:[%s697_s2 + $0x8] sm:$0xff]  ;;  %v246_v9 = vld [vmem:[%s697_s2] sm:$0xff]  ;;  %s402_s28 = sshll.u32 %s159_s27, 3 }
  0x16   : > { %422 = vmatprep.subr.mxu0 %v547_v1  ;;  %439 = vmatprep.mubr.msk.f32.mxu1 %vm548_vm0, %v547_v1  ;;  %s165_s9 = scalar_lea.vmem %s695_s0, %s403_s4  ;;  %s161_s30 = scalar_lea.vmem [#allocation2], %s402_s28 }
  0x17   : > { %423 = vmatpush3.msra.mxu0 %v169_v2  ;;  %v166_v5 = vld [vmem:[%s165_s9] sm:$0xff]  ;;  %432 = vmatpush3.msra.mxu1 %v249_v6  ;;  %s339_s4 = sshll.u32 %s161_s30, 4  ;;  %s489_s10 = sshll.u32 %s549_s16, 4  ;;  %s656_s4 = int_to_ptr.vmem [resolvable:$true] %s339_s4  ;;  %s490_s10 = int_to_ptr.vmem [resolvable:$false] %s489_s10 }
  0x18   : > { %424 = vmatprep.subr.mxu0 %v547_v1  ;;  %433 = vmatprep.subr.mxu1 %v547_v1  ;;  %s485_s9 = scalar_lea.vmem %s656_s4, 128  ;;  %s491_s11 = scalar_lea.vmem %s490_s10, 256 }
  0x19   : > { %425 = vmatpush3.msra.mxu0 %v168_v3  ;;  %434 = vmatpush3.msra.mxu1 %v248_v7  ;;  %p486_p11 = scmp.ne.s32.totalorder %s656_s4, %s485_s9  ;;  %p492_p0 = scmp.lt.s32.totalorder %s656_s4, %s490_s10 }
  0x1a   : > { %426 = vmatprep.subr.mxu0 %v547_v1  ;;  %435 = vmatprep.subr.mxu1 %v547_v1  ;;  %p493_p1 = scmp.lt.s32.totalorder %s491_s11, %s485_s9 }
  0x1b   : > { %427 = vmatpush3.msra.mxu0 %v167_v4  ;;  %436 = vmatpush3.msra.mxu1 %v247_v8  ;;  %p487_p12 = pnand %p486_p11, %p608_p5 }
  0x1c   : > { %429 = vmatmul.mubr.msk.f32.vlgmr.msra.gmra.mxu0 %vm171_vm1, %v166_v5  ;;  %437 = vmatprep.subr.mxu1 %v547_v1  ;;  %p494_p2 = por %p493_p1, %p492_p0 }
  0x1d   : > { %438 = vmatpush3.msra.mxu1 %v246_v9  ;;  %p488_p13 = pneg %p487_p12 }
  0x1f   : > { %p495_p3 = pnand %p494_p2, %p488_p13 }
  0xdc   : > { %v241_v10 = vpop.f32.mrf.mxu0 }
  0xdd   : > { %483 = vtanh.f32 %v241_v10 }
  0xde   : > { %v430_v11 = vpop.f32.mrf.mxu0 }
  0xea   : > { %v484_v12 = vpop.eup %483 }
  0xeb   : > { %440 = vmatmul.mubr.msk.f32.vlgmr.msra.gmra.mxu1 %vm171_vm1, %v484_v12 }
 0x1ab   : > { %v319_v13 = vpop.f32.mrf.mxu1 }
 0x1ac   : > { %324 = vst.msk [vmem:[%s161_s30] sm:$0xff] %vm323_vm2, %v319_v13 }
 0x1ad   : > { %v441_v14 = vpop.f32.mrf.mxu1 }
 0x1ae   : > { %498 = shalt.err (!%p495_p3)
}
 0x1af   : > { %s499_s17 = scalar_lea.hbm %s654_s7, 128  ;;  %s503_s24 = scalar_lea.hbm %s698_s3, 256 }
 0x1b0   : > { %p500_p4 = scmp.ne.s32.totalorder %s654_s7, %s499_s17  ;;  %p504_p9 = scmp.lt.s32.totalorder %s654_s7, %s698_s3 }
 0x1b1   : > { %p505_p10 = scmp.lt.s32.totalorder %s503_s24, %s499_s17 }
 0x1b2   : > { %p501_p7 = pnand %p500_p4, %p608_p5 }
 0x1b3   : > { %p506_p11 = por %p505_p10, %p504_p9 }
 0x1b4   : > { %p502_p8 = pneg %p501_p7 }
 0x1b6   : > { %p507_p12 = pnand %p506_p11, %p502_p8 }
 0x1b8   : > { %510 = shalt.err (!%p507_p12)
}
 0x1b9   : > { %442 = dma.vmem_to_hbm [thread:$0]  (%p608_p5), %s656_s4, 128, %s654_s7, %s326_s8  }
 0x1ba PF: > { %p448_p13 = scmp.ge.s32.totalorder %s545_s15, 2  ;;  %s351_s27 = sand.u32 1, %s533_s12  }
 0x1bb   : > { %s352_s28 = scalar_lea.sflag [#allocation3], %s351_s27 }
 0x1bc   : > { %p445_p0 = pnand %p448_p13, %p612_p6 }
 0x1be   : > { %p446_p1 = pneg %p445_p0 }
 0x1c0   : > { %528 = dma.done.wait (%p446_p1), %s352_s28, 128  }
 0x1c1   : > { %530 = vsyncadd (%p446_p1), %s352_s28, 4294967168  ;;  %p13_p2 = scmp.ge.s32.totalorder %s595_s18, 4   ;;  %s701_s12 = smov %s537_s13 }
 0x1c2   : > { %s702_s13 = smov %s541_s14  ;;  %s703_s14 = smov %s606_s21 }
 0x1c3   : > { %s704_s15 = smov %s595_s18  ;;  %15 = sbr.rel (!%p13_p2) target bundleno = 3 (0x3), region = 67 }
 0x1c8   :  { %357 = vsyncpa [#allocation3], 1 }
 0x1c9   :  { %359 = vsyncpa [#allocation3 + $0x1], 1 }

</bundles_post_ra>
